<compile_context>
chip_gen: v7x
topology: tpu7x:2x2x1
jax: 0.10.0
libtpu: 0.0.40
codegen_flags: <defaults>
</compile_context>

<pallas_src>
import functools
import math

import jax
import jax.numpy as jnp
from jax import lax
from jax.experimental import pallas as pl
from jax.experimental.pallas import tpu as pltpu

_NEG_BIG = -1e30  # finite stand-in for -inf (keeps exp()/max() NaN-free)


def mine_kernel(xt_ref, yt_ref, yst_ref, w1xt_ref, w1yt_ref, b1t_ref, w2t_ref,
                b2_ref, out_ref, sum0_ref, m_ref, s_ref, *,
                n_valid, bn, blocks_per_part):
    part = pl.program_id(0)   # parallel axis (TensorCore split on v7x)
    i = pl.program_id(1)      # reduction axis over N-blocks of this part

    @pl.when(i == 0)
    def _init():
        sum0_ref[...] = jnp.zeros_like(sum0_ref)
        m_ref[...] = jnp.full_like(m_ref, _NEG_BIG)
        s_ref[...] = jnp.zeros_like(s_ref)

    # First Linear, split into shared x-side and two y-side products.
    # (H, x_dim) @ (x_dim, bn) -> (H, bn); f32 accumulation.
    xw = jnp.dot(w1xt_ref[...], xt_ref[...], preferred_element_type=jnp.float32)
    yw0 = jnp.dot(w1yt_ref[...], yt_ref[...], preferred_element_type=jnp.float32)
    yw1 = jnp.dot(w1yt_ref[...], yst_ref[...], preferred_element_type=jnp.float32)

    b1 = b1t_ref[...]          # (H, 1)  f32
    w2 = w2t_ref[...]          # (H, 1)  f32
    b2 = b2_ref[...]           # (1, 1)  f32

    pre = xw + b1                                   # shared x-side term
    h0 = jnp.maximum(pre + yw0, 0.0)                # (H, bn)  joint
    h1 = jnp.maximum(pre + yw1, 0.0)                # (H, bn)  marginal

    # Second Linear: per-lane multiply + sublane reduce (stays lane-dense).
    t0 = jnp.sum(h0 * w2, axis=0, keepdims=True) + b2    # (1, bn)
    t1 = jnp.sum(h1 * w2, axis=0, keepdims=True) + b2    # (1, bn)

    # Row-validity mask for the zero-padded tail of the last block.
    blk = part * blocks_per_part + i
    col = lax.broadcasted_iota(jnp.int32, t0.shape, 1)
    valid = (blk * bn + col) < n_valid

    # Lane-vector accumulators; collapse to scalars only at finalize.
    sum0_ref[...] += jnp.where(valid, t0, 0.0)

    t1m = jnp.where(valid, t1, _NEG_BIG)
    m_prev = m_ref[...]
    m_new = jnp.maximum(m_prev, t1m)
    s_ref[...] = s_ref[...] * jnp.exp(m_prev - m_new) + jnp.exp(t1m - m_new)
    m_ref[...] = m_new

    @pl.when(i == pl.num_programs(1) - 1)
    def _finalize():
        sum0 = jnp.sum(sum0_ref[...], keepdims=True)                  # (1, 1)
        m = m_ref[...]
        mx = jnp.max(m, keepdims=True)                                # (1, 1)
        sx = jnp.sum(jnp.exp(m - mx) * s_ref[...], keepdims=True)     # (1, 1)
        # Pack the three partial scalars into rows 0/1/2 of this part's tile.
        rows = lax.broadcasted_iota(jnp.int32, out_ref.shape, 0)
        out_ref[...] = (jnp.where(rows == 0, 1.0, 0.0) * sum0 +
                        jnp.where(rows == 1, 1.0, 0.0) * mx +
                        jnp.where(rows == 2, 1.0, 0.0) * sx
                        ).astype(out_ref.dtype)


def _round_up(x, m):
    return ((x + m - 1) // m) * m


def mine_forward(x_samples, y_samples, w1, b1, w2, b2, shuffle_key, *,
                 block_rows=4096, compute_dtype=jnp.bfloat16,
                 num_core_splits=2):
    """MINE lower bound.  Shuffle-index generation / gather / transposes are
    glue JAX; everything else runs in the Pallas kernel."""
    n, x_dim = x_samples.shape
    y_dim = y_samples.shape[1]
    hidden = w1.shape[1]

    # torch.randint-style sampling with replacement (matches the PyTorch spec).
    random_index = jax.random.randint(shuffle_key, (n,), 0, n)

    # Cast BEFORE the gather/transpose so the shuffled copy is produced and
    # streamed in the (narrow) compute dtype.
    x_c = x_samples.astype(compute_dtype)
    y_c = y_samples.astype(compute_dtype)
    ys_c = y_c[random_index]

    # Lane-dense layout: N on the lane axis.
    xt = x_c.T           # (x_dim, n)
    yt = y_c.T           # (y_dim, n)
    yst = ys_c.T         # (y_dim, n)

    # Tiling: bn is a multiple of 128; pad N up to num_parts*blocks_per_part*bn.
    bn = _round_up(min(block_rows, _round_up(n, 128)), 128)
    n_blocks = pl.cdiv(n, bn)
    num_parts = max(1, min(num_core_splits, n_blocks))
    blocks_per_part = pl.cdiv(n_blocks, num_parts)
    n_pad = num_parts * blocks_per_part * bn
    if n_pad != n:
        pad = ((0, 0), (0, n_pad - n))
        xt = jnp.pad(xt, pad)
        yt = jnp.pad(yt, pad)
        yst = jnp.pad(yst, pad)

    # Transposed weights for the (features, N) layout.  Matmul operands in
    # compute_dtype; bias / second-linear / logsumexp math in f32.
    w1xt = w1[:x_dim].T.astype(compute_dtype)              # (H, x_dim)
    w1yt = w1[x_dim:].T.astype(compute_dtype)              # (H, y_dim)
    b1t = b1.reshape(1, hidden).T.astype(jnp.float32)      # (H, 1)
    w2t = w2.reshape(1, hidden).T.astype(jnp.float32)      # (H, 1)
    b2f = b2.reshape(1, 1).astype(jnp.float32)             # (1, 1)

    kernel = functools.partial(mine_kernel, n_valid=n, bn=bn,
                               blocks_per_part=blocks_per_part)

    data_map = lambda c, i: (0, c * blocks_per_part + i)
    const_map = lambda c, i: (0, 0)

    parts = pl.pallas_call(
        kernel,
        out_shape=jax.ShapeDtypeStruct((num_parts * 8, 128), jnp.float32),
        grid_spec=pltpu.PrefetchScalarGridSpec(
            num_scalar_prefetch=0,
            grid=(num_parts, blocks_per_part),
            in_specs=[
                pl.BlockSpec((x_dim, bn), data_map),          # x^T tile
                pl.BlockSpec((y_dim, bn), data_map),          # y^T tile
                pl.BlockSpec((y_dim, bn), data_map),          # y_shuffle^T tile
                pl.BlockSpec((hidden, x_dim), const_map),     # w1_x^T (resident)
                pl.BlockSpec((hidden, y_dim), const_map),     # w1_y^T (resident)
                pl.BlockSpec((hidden, 1), const_map),         # b1^T   (resident)
                pl.BlockSpec((hidden, 1), const_map),         # w2^T   (resident)
                pl.BlockSpec((1, 1), const_map),              # b2     (resident)
            ],
            out_specs=pl.BlockSpec((8, 128), lambda c, i: (c, 0)),
            scratch_shapes=[pltpu.VMEM((1, bn), jnp.float32),   # per-lane sum(t0)
                            pltpu.VMEM((1, bn), jnp.float32),   # per-lane run. max
                            pltpu.VMEM((1, bn), jnp.float32)],  # per-lane run. sumexp
        ),
        compiler_params=pltpu.CompilerParams(
            dimension_semantics=("parallel", "arbitrary"),
            vmem_limit_bytes=32 * 1024 * 1024,   # safe on v5e/v6e/v7x
        ),
    )(xt, yt, yst, w1xt, w1yt, b1t, w2t, b2f)

    # Merge per-part partials (mean numerator + logsumexp combine) in JAX.
    parts = parts.reshape(num_parts, 8, 128)
    sum0_c = parts[:, 0, 0]
    m_c = parts[:, 1, 0]
    s_c = parts[:, 2, 0]

    mean_t0 = jnp.sum(sum0_c) / n
    m_g = jnp.max(m_c)
    s_g = jnp.sum(jnp.exp(m_c - m_g) * s_c)
    t1_term = m_g + jnp.log(s_g) - math.log(n)
    return mean_t0 - t1_term


def init_mine_params(key, x_dim, y_dim, hidden_size):
    """Mimics PyTorch nn.Linear default init: U(-1/sqrt(fan_in), 1/sqrt(fan_in))."""
    d = x_dim + y_dim
    k1, k2, k3, k4 = jax.random.split(key, 4)
    lim1 = 1.0 / math.sqrt(d)
    lim2 = 1.0 / math.sqrt(hidden_size)
    w1 = jax.random.uniform(k1, (d, hidden_size), jnp.float32, -lim1, lim1)
    b1 = jax.random.uniform(k2, (1, hidden_size), jnp.float32, -lim1, lim1)
    w2 = jax.random.uniform(k3, (1, hidden_size), jnp.float32, -lim2, lim2)
    b2 = jax.random.uniform(k4, (1, 1), jnp.float32, -lim2, lim2)
    return w1, b1, w2, b2


def reference_forward(x, y, w1, b1, w2, b2, shuffle_key):
    """Pure-JAX reference (mirrors the PyTorch module exactly)."""
    n = y.shape[0]
    idx = jax.random.randint(shuffle_key, (n,), 0, n)
    y_shuf = y[idx]

    def T(inp):
        h = jnp.maximum(inp @ w1 + b1, 0.0)
        return h @ w2.T + b2  # (N, 1)

    t0 = T(jnp.concatenate([x, y], axis=-1))
    t1 = T(jnp.concatenate([x, y_shuf], axis=-1)).reshape(-1)
    t1_term = jax.nn.logsumexp(t1) - math.log(t1.shape[0])
    return jnp.mean(t0) - t1_term


if __name__ == "__main__":
    key = jax.random.PRNGKey(0)
    k_x, k_y, k_p, k_shuf = jax.random.split(key, 4)

    # Small shapes consistent with MINE's forward: flat sample batches.
    N, x_dim, y_dim, hidden = 300, 8, 8, 32

    x = jax.random.normal(k_x, (N, x_dim), jnp.float32)
    y = jax.random.normal(k_y, (N, y_dim), jnp.float32)
    w1, b1, w2, b2 = init_mine_params(k_p, x_dim, y_dim, hidden)

    ref = reference_forward(x, y, w1, b1, w2, b2, k_shuf)

    # 1) f32, small blocks -> 2 parts x 2 blocks grid, padded ragged tail:
    #    exercises the online mean / online logsumexp lane accumulators and
    #    the cross-part merge.
    out_tiled = mine_forward(x, y, w1, b1, w2, b2, k_shuf,
                             block_rows=128, compute_dtype=jnp.float32)
    out_tiled = jax.block_until_ready(out_tiled)
    assert jnp.allclose(out_tiled, ref, atol=1e-4, rtol=1e-4), (out_tiled, ref)

    # 2) f32, default tiling (single padded block, single part).
    out_full = mine_forward(x, y, w1, b1, w2, b2, k_shuf,
                            compute_dtype=jnp.float32)
    out_full = jax.block_until_ready(out_full)
    assert jnp.allclose(out_full, ref, atol=1e-4, rtol=1e-4), (out_full, ref)

    # 3) Default bf16 streaming path (f32 accumulation) — loose smoke check;
    #    the MINE estimate drifts slightly with bf16 inputs/weights.
    out_bf16 = mine_forward(x, y, w1, b1, w2, b2, k_shuf)
    out_bf16 = jax.block_until_ready(out_bf16)
    assert jnp.isfinite(out_bf16) and abs(float(out_bf16) - float(ref)) < 0.1, (
        out_bf16, ref)

    print("KERNEL_OK")
</pallas_src>

<mosaic_0001>
module attributes {stable_mosaic.version = 11 : i64} {
  func.func @mine_kernel(%arg0: i32, %arg1: i32, %arg2: memref<8x128xf32, #tpu.memory_space<vmem>>, %arg3: memref<8x128xf32, #tpu.memory_space<vmem>>, %arg4: memref<8x128xf32, #tpu.memory_space<vmem>>, %arg5: memref<32x8xf32, #tpu.memory_space<vmem>>, %arg6: memref<32x8xf32, #tpu.memory_space<vmem>>, %arg7: memref<32x1xf32, #tpu.memory_space<vmem>>, %arg8: memref<32x1xf32, #tpu.memory_space<vmem>>, %arg9: memref<1x1xf32, #tpu.memory_space<vmem>>, %arg10: memref<8x128xf32, #tpu.memory_space<vmem>>, %arg11: memref<1x128xf32, #tpu.memory_space<vmem>>, %arg12: memref<1x128xf32, #tpu.memory_space<vmem>>, %arg13: memref<1x128xf32, #tpu.memory_space<vmem>>) attributes {dimension_semantics = [#tpu.dimension_semantics<parallel>, #tpu.dimension_semantics<arbitrary>], iteration_bounds = array<i64: 2, 2>, scalar_prefetch = 0 : i64, scratch_operands = 3 : i64, tpu.core_type = #tpu.core_type<tc>, window_params = [{transform_indices = @transform_0, window_bounds = array<i64: 8, 128>}, {transform_indices = @transform_1, window_bounds = array<i64: 8, 128>}, {transform_indices = @transform_2, window_bounds = array<i64: 8, 128>}, {pipeline_mode = #tpu.pipeline_mode<synchronous>, transform_indices = @transform_3, window_bounds = array<i64: 32, 8>}, {pipeline_mode = #tpu.pipeline_mode<synchronous>, transform_indices = @transform_4, window_bounds = array<i64: 32, 8>}, {pipeline_mode = #tpu.pipeline_mode<synchronous>, transform_indices = @transform_5, window_bounds = array<i64: 32, 1>}, {pipeline_mode = #tpu.pipeline_mode<synchronous>, transform_indices = @transform_6, window_bounds = array<i64: 32, 1>}, {pipeline_mode = #tpu.pipeline_mode<synchronous>, transform_indices = @transform_7, window_bounds = array<i64: 1, 1>}, {transform_indices = @transform_8, window_bounds = array<i64: 8, 128>}]} {
    %c0_i32 = arith.constant 0 : i32
    %0 = arith.cmpi eq, %arg1, %c0_i32 : i32
    %1 = arith.extui %0 : i1 to i32
    %c0_i32_0 = arith.constant 0 : i32
    %2 = arith.cmpi ne, %1, %c0_i32_0 : i32
    scf.if %2 {
      %cst_39 = arith.constant 0.000000e+00 : f32
      %64 = vector.broadcast %cst_39 : f32 to vector<1x128xf32>
      %c0_40 = arith.constant 0 : index
      %c0_41 = arith.constant 0 : index
      %65 = vector.load %arg11[%c0_40, %c0_41] : memref<1x128xf32, #tpu.memory_space<vmem>>, vector<1x128xf32>
      tpu.vector_store %arg11[%c0_40, %c0_41], %64 {strides = array<i32>} : memref<1x128xf32, #tpu.memory_space<vmem>>, vector<1x128xf32>,
      %cst_42 = arith.constant -1.000000e+30 : f32
      %66 = vector.broadcast %cst_42 : f32 to vector<1x128xf32>
      %c0_43 = arith.constant 0 : index
      %c0_44 = arith.constant 0 : index
      %67 = vector.load %arg12[%c0_43, %c0_44] : memref<1x128xf32, #tpu.memory_space<vmem>>, vector<1x128xf32>
      tpu.vector_store %arg12[%c0_43, %c0_44], %66 {strides = array<i32>} : memref<1x128xf32, #tpu.memory_space<vmem>>, vector<1x128xf32>,
      %cst_45 = arith.constant 0.000000e+00 : f32
      %68 = vector.broadcast %cst_45 : f32 to vector<1x128xf32>
      %c0_46 = arith.constant 0 : index
      %c0_47 = arith.constant 0 : index
      %69 = vector.load %arg13[%c0_46, %c0_47] : memref<1x128xf32, #tpu.memory_space<vmem>>, vector<1x128xf32>
      tpu.vector_store %arg13[%c0_46, %c0_47], %68 {strides = array<i32>} : memref<1x128xf32, #tpu.memory_space<vmem>>, vector<1x128xf32>,
    } else {
    }
    %c0 = arith.constant 0 : index
    %c0_1 = arith.constant 0 : index
    %3 = vector.load %arg5[%c0, %c0_1] : memref<32x8xf32, #tpu.memory_space<vmem>>, vector<32x8xf32>
    %c0_2 = arith.constant 0 : index
    %c0_3 = arith.constant 0 : index
    %4 = vector.load %arg2[%c0_2, %c0_3] : memref<8x128xf32, #tpu.memory_space<vmem>>, vector<8x128xf32>
    %cst = arith.constant dense<0.000000e+00> : vector<32x128xf32>
    %5 = tpu.matmul %3, %4, %cst {dimension_numbers = #tpu.dot_dimension_numbers<[1], [0], [0], [1], [0, 0, 1, 1], [], []>} : vector<32x8xf32>, vector<8x128xf32>, vector<32x128xf32> -> vector<32x128xf32>
    %c0_4 = arith.constant 0 : index
    %c0_5 = arith.constant 0 : index
    %6 = vector.load %arg6[%c0_4, %c0_5] : memref<32x8xf32, #tpu.memory_space<vmem>>, vector<32x8xf32>
    %c0_6 = arith.constant 0 : index
    %c0_7 = arith.constant 0 : index
    %7 = vector.load %arg3[%c0_6, %c0_7] : memref<8x128xf32, #tpu.memory_space<vmem>>, vector<8x128xf32>
    %cst_8 = arith.constant dense<0.000000e+00> : vector<32x128xf32>
    %8 = tpu.matmul %6, %7, %cst_8 {dimension_numbers = #tpu.dot_dimension_numbers<[1], [0], [0], [1], [0, 0, 1, 1], [], []>} : vector<32x8xf32>, vector<8x128xf32>, vector<32x128xf32> -> vector<32x128xf32>
    %c0_9 = arith.constant 0 : index
    %c0_10 = arith.constant 0 : index
    %9 = vector.load %arg6[%c0_9, %c0_10] : memref<32x8xf32, #tpu.memory_space<vmem>>, vector<32x8xf32>
    %c0_11 = arith.constant 0 : index
    %c0_12 = arith.constant 0 : index
    %10 = vector.load %arg4[%c0_11, %c0_12] : memref<8x128xf32, #tpu.memory_space<vmem>>, vector<8x128xf32>
    %cst_13 = arith.constant dense<0.000000e+00> : vector<32x128xf32>
    %11 = tpu.matmul %9, %10, %cst_13 {dimension_numbers = #tpu.dot_dimension_numbers<[1], [0], [0], [1], [0, 0, 1, 1], [], []>} : vector<32x8xf32>, vector<8x128xf32>, vector<32x128xf32> -> vector<32x128xf32>
    %c0_14 = arith.constant 0 : index
    %c0_15 = arith.constant 0 : index
    %12 = vector.load %arg7[%c0_14, %c0_15] : memref<32x1xf32, #tpu.memory_space<vmem>>, vector<32x1xf32>
    %c0_16 = arith.constant 0 : index
    %c0_17 = arith.constant 0 : index
    %13 = vector.load %arg8[%c0_16, %c0_17] : memref<32x1xf32, #tpu.memory_space<vmem>>, vector<32x1xf32>
    %c0_18 = arith.constant 0 : index
    %c0_19 = arith.constant 0 : index
    %14 = vector.load %arg9[%c0_18, %c0_19] : memref<1x1xf32, #tpu.memory_space<vmem>>, vector<1x1xf32>
    %15 = vector.broadcast %12 : vector<32x1xf32> to vector<32x128xf32>
    %16 = arith.addf %5, %15 : vector<32x128xf32>
    %17 = arith.addf %16, %8 : vector<32x128xf32>
    %cst_20 = arith.constant 0.000000e+00 : f32
    %18 = vector.broadcast %cst_20 : f32 to vector<32x128xf32>
    %19 = arith.maximumf %17, %18 : vector<32x128xf32>
    %20 = arith.addf %16, %11 : vector<32x128xf32>
    %cst_21 = arith.constant 0.000000e+00 : f32
    %21 = vector.broadcast %cst_21 : f32 to vector<32x128xf32>
    %22 = arith.maximumf %20, %21 : vector<32x128xf32>
    %23 = vector.broadcast %13 : vector<32x1xf32> to vector<32x128xf32>
    %24 = arith.mulf %19, %23 : vector<32x128xf32>
    %cst_22 = arith.constant dense<0.000000e+00> : vector<128xf32>
    %25 = vector.multi_reduction <add>, %24, %cst_22 [0] : vector<32x128xf32> to vector<128xf32>
    %26 = vector.shape_cast %25 : vector<128xf32> to vector<1x128xf32>
    %27 = vector.broadcast %14 : vector<1x1xf32> to vector<1x128xf32>
    %28 = arith.addf %26, %27 : vector<1x128xf32>
    %29 = vector.broadcast %13 : vector<32x1xf32> to vector<32x128xf32>
    %30 = arith.mulf %22, %29 : vector<32x128xf32>
    %cst_23 = arith.constant dense<0.000000e+00> : vector<128xf32>
    %31 = vector.multi_reduction <add>, %30, %cst_23 [0] : vector<32x128xf32> to vector<128xf32>
    %32 = vector.shape_cast %31 : vector<128xf32> to vector<1x128xf32>
    %33 = vector.broadcast %14 : vector<1x1xf32> to vector<1x128xf32>
    %34 = arith.addf %32, %33 : vector<1x128xf32>
    %c2_i32 = arith.constant 2 : i32
    %35 = arith.muli %arg0, %c2_i32 : i32
    %36 = arith.addi %35, %arg1 : i32
    %37 = tpu.iota {dimensions = array<i32: 1>} : vector<1x128xi32>
    %c128_i32 = arith.constant 128 : i32
    %38 = arith.muli %36, %c128_i32 : i32
    %39 = vector.broadcast %38 : i32 to vector<1x128xi32>
    %40 = arith.addi %39, %37 : vector<1x128xi32>
    %c300_i32 = arith.constant 300 : i32
    %41 = vector.broadcast %c300_i32 : i32 to vector<1x128xi32>
    %42 = arith.cmpi slt, %40, %41 : vector<1x128xi32>
    %c0_24 = arith.constant 0 : index
    %c0_25 = arith.constant 0 : index
    %43 = vector.load %arg11[%c0_24, %c0_25] : memref<1x128xf32, #tpu.memory_space<vmem>>, vector<1x128xf32>
    %cst_26 = arith.constant 0.000000e+00 : f32
    %44 = vector.broadcast %cst_26 : f32 to vector<1x128xf32>
    %45 = arith.select %42, %28, %44 : vector<1x128xi1>, vector<1x128xf32>
    %46 = arith.addf %43, %45 : vector<1x128xf32>
    %c0_27 = arith.constant 0 : index
    %c0_28 = arith.constant 0 : index
    %47 = vector.load %arg11[%c0_27, %c0_28] : memref<1x128xf32, #tpu.memory_space<vmem>>, vector<1x128xf32>
    tpu.vector_store %arg11[%c0_27, %c0_28], %46 {strides = array<i32>} : memref<1x128xf32, #tpu.memory_space<vmem>>, vector<1x128xf32>,
    %cst_29 = arith.constant -1.000000e+30 : f32
    %48 = vector.broadcast %cst_29 : f32 to vector<1x128xf32>
    %49 = arith.select %42, %34, %48 : vector<1x128xi1>, vector<1x128xf32>
    %c0_30 = arith.constant 0 : index
    %c0_31 = arith.constant 0 : index
    %50 = vector.load %arg12[%c0_30, %c0_31] : memref<1x128xf32, #tpu.memory_space<vmem>>, vector<1x128xf32>
    %51 = arith.maximumf %50, %49 : vector<1x128xf32>
    %c0_32 = arith.constant 0 : index
    %c0_33 = arith.constant 0 : index
    %52 = vector.load %arg13[%c0_32, %c0_33] : memref<1x128xf32, #tpu.memory_space<vmem>>, vector<1x128xf32>
    %53 = arith.subf %50, %51 : vector<1x128xf32>
    %54 = math.exp %53 : vector<1x128xf32>
    %55 = arith.mulf %52, %54 : vector<1x128xf32>
    %56 = arith.subf %49, %51 : vector<1x128xf32>
    %57 = math.exp %56 : vector<1x128xf32>
    %58 = arith.addf %55, %57 : vector<1x128xf32>
    %c0_34 = arith.constant 0 : index
    %c0_35 = arith.constant 0 : index
    %59 = vector.load %arg13[%c0_34, %c0_35] : memref<1x128xf32, #tpu.memory_space<vmem>>, vector<1x128xf32>
    tpu.vector_store %arg13[%c0_34, %c0_35], %58 {strides = array<i32>} : memref<1x128xf32, #tpu.memory_space<vmem>>, vector<1x128xf32>,
    %c0_36 = arith.constant 0 : index
    %c0_37 = arith.constant 0 : index
    %60 = vector.load %arg12[%c0_36, %c0_37] : memref<1x128xf32, #tpu.memory_space<vmem>>, vector<1x128xf32>
    tpu.vector_store %arg12[%c0_36, %c0_37], %51 {strides = array<i32>} : memref<1x128xf32, #tpu.memory_space<vmem>>, vector<1x128xf32>,
    %c1_i32 = arith.constant 1 : i32
    %61 = arith.cmpi eq, %arg1, %c1_i32 : i32
    %62 = arith.extui %61 : i1 to i32
    %c0_i32_38 = arith.constant 0 : i32
    %63 = arith.cmpi ne, %62, %c0_i32_38 : i32
    scf.if %63 {
      %c0_39 = arith.constant 0 : index
      %c0_40 = arith.constant 0 : index
      %64 = vector.load %arg11[%c0_39, %c0_40] : memref<1x128xf32, #tpu.memory_space<vmem>>, vector<1x128xf32>
      %65 = vector.shape_cast %64 : vector<1x128xf32> to vector<1x1x128xf32>
      %cst_41 = arith.constant dense<0.000000e+00> : vector<1xf32>
      %66 = vector.multi_reduction <add>, %65, %cst_41 [1, 2] : vector<1x1x128xf32> to vector<1xf32>
      %67 = vector.shape_cast %66 : vector<1xf32> to vector<1x1x1xf32>
      %68 = vector.extract %67[0, 0, 0] : f32 from vector<1x1x1xf32>
      %69 = vector.broadcast %68 : f32 to vector<1x1xf32>
      %c0_42 = arith.constant 0 : index
      %c0_43 = arith.constant 0 : index
      %70 = vector.load %arg12[%c0_42, %c0_43] : memref<1x128xf32, #tpu.memory_space<vmem>>, vector<1x128xf32>
      %71 = vector.shape_cast %70 : vector<1x128xf32> to vector<1x1x128xf32>
      %cst_44 = arith.constant dense<0xFF800000> : vector<1xf32>
      %72 = vector.multi_reduction <maximumf>, %71, %cst_44 [1, 2] : vector<1x1x128xf32> to vector<1xf32>
      %73 = vector.shape_cast %72 : vector<1xf32> to vector<1x1x1xf32>
      %74 = vector.extract %73[0, 0, 0] : f32 from vector<1x1x1xf32>
      %75 = vector.broadcast %74 : f32 to vector<1x1xf32>
      %76 = vector.broadcast %75 : vector<1x1xf32> to vector<1x128xf32>
      %77 = arith.subf %70, %76 : vector<1x128xf32>
      %78 = math.exp %77 : vector<1x128xf32>
      %c0_45 = arith.constant 0 : index
      %c0_46 = arith.constant 0 : index
      %79 = vector.load %arg13[%c0_45, %c0_46] : memref<1x128xf32, #tpu.memory_space<vmem>>, vector<1x128xf32>
      %80 = arith.mulf %78, %79 : vector<1x128xf32>
      %81 = vector.shape_cast %80 : vector<1x128xf32> to vector<1x1x128xf32>
      %cst_47 = arith.constant dense<0.000000e+00> : vector<1xf32>
      %82 = vector.multi_reduction <add>, %81, %cst_47 [1, 2] : vector<1x1x128xf32> to vector<1xf32>
      %83 = vector.shape_cast %82 : vector<1xf32> to vector<1x1x1xf32>
      %84 = vector.extract %83[0, 0, 0] : f32 from vector<1x1x1xf32>
      %85 = vector.broadcast %84 : f32 to vector<1x1xf32>
      %86 = tpu.iota {dimensions = array<i32: 0>} : vector<8x128xi32>
      %c0_i32_48 = arith.constant 0 : i32
      %87 = vector.broadcast %c0_i32_48 : i32 to vector<8x128xi32>
      %88 = arith.cmpi eq, %86, %87 : vector<8x128xi32>
      %cst_49 = arith.constant 1.000000e+00 : f32
      %cst_50 = arith.constant 0.000000e+00 : f32
      %89 = vector.broadcast %cst_49 : f32 to vector<8x128xf32>
      %90 = vector.broadcast %cst_50 : f32 to vector<8x128xf32>
      %91 = arith.select %88, %89, %90 : vector<8x128xi1>, vector<8x128xf32>
      %92 = vector.broadcast %69 : vector<1x1xf32> to vector<8x128xf32>
      %93 = arith.mulf %91, %92 : vector<8x128xf32>
      %c1_i32_51 = arith.constant 1 : i32
      %94 = vector.broadcast %c1_i32_51 : i32 to vector<8x128xi32>
      %95 = arith.cmpi eq, %86, %94 : vector<8x128xi32>
      %cst_52 = arith.constant 1.000000e+00 : f32
      %cst_53 = arith.constant 0.000000e+00 : f32
      %96 = vector.broadcast %cst_52 : f32 to vector<8x128xf32>
      %97 = vector.broadcast %cst_53 : f32 to vector<8x128xf32>
      %98 = arith.select %95, %96, %97 : vector<8x128xi1>, vector<8x128xf32>
      %99 = vector.broadcast %75 : vector<1x1xf32> to vector<8x128xf32>
      %100 = arith.mulf %98, %99 : vector<8x128xf32>
      %101 = arith.addf %93, %100 : vector<8x128xf32>
      %c2_i32_54 = arith.constant 2 : i32
      %102 = vector.broadcast %c2_i32_54 : i32 to vector<8x128xi32>
      %103 = arith.cmpi eq, %86, %102 : vector<8x128xi32>
      %cst_55 = arith.constant 1.000000e+00 : f32
      %cst_56 = arith.constant 0.000000e+00 : f32
      %104 = vector.broadcast %cst_55 : f32 to vector<8x128xf32>
      %105 = vector.broadcast %cst_56 : f32 to vector<8x128xf32>
      %106 = arith.select %103, %104, %105 : vector<8x128xi1>, vector<8x128xf32>
      %107 = vector.broadcast %85 : vector<1x1xf32> to vector<8x128xf32>
      %108 = arith.mulf %106, %107 : vector<8x128xf32>
      %109 = arith.addf %101, %108 : vector<8x128xf32>
      %c0_57 = arith.constant 0 : index
      %c0_58 = arith.constant 0 : index
      %110 = vector.load %arg10[%c0_57, %c0_58] : memref<8x128xf32, #tpu.memory_space<vmem>>, vector<8x128xf32>
      tpu.vector_store %arg10[%c0_57, %c0_58], %109 {strides = array<i32>} : memref<8x128xf32, #tpu.memory_space<vmem>>, vector<8x128xf32>,
    } else {
    }
    return
  }
  func.func @transform_0(%arg0: i32, %arg1: i32) -> (i32, i32) {
    %c2_i32 = arith.constant 2 : i32
    %0 = arith.muli %arg0, %c2_i32 : i32
    %1 = arith.addi %0, %arg1 : i32
    %c0_i32 = arith.constant 0 : i32
    %c0_i32_0 = arith.constant 0 : i32
    return %c0_i32, %1 : i32, i32
  }
  func.func @transform_1(%arg0: i32, %arg1: i32) -> (i32, i32) {
    %c2_i32 = arith.constant 2 : i32
    %0 = arith.muli %arg0, %c2_i32 : i32
    %1 = arith.addi %0, %arg1 : i32
    %c0_i32 = arith.constant 0 : i32
    %c0_i32_0 = arith.constant 0 : i32
    return %c0_i32, %1 : i32, i32
  }
  func.func @transform_2(%arg0: i32, %arg1: i32) -> (i32, i32) {
    %c2_i32 = arith.constant 2 : i32
    %0 = arith.muli %arg0, %c2_i32 : i32
    %1 = arith.addi %0, %arg1 : i32
    %c0_i32 = arith.constant 0 : i32
    %c0_i32_0 = arith.constant 0 : i32
    return %c0_i32, %1 : i32, i32
  }
  func.func @transform_3(%arg0: i32, %arg1: i32) -> (i32, i32) {
    %c0_i32 = arith.constant 0 : i32
    %c0_i32_0 = arith.constant 0 : i32
    %c0_i32_1 = arith.constant 0 : i32
    return %c0_i32, %c0_i32_0 : i32, i32
  }
  func.func @transform_4(%arg0: i32, %arg1: i32) -> (i32, i32) {
    %c0_i32 = arith.constant 0 : i32
    %c0_i32_0 = arith.constant 0 : i32
    %c0_i32_1 = arith.constant 0 : i32
    return %c0_i32, %c0_i32_0 : i32, i32
  }
  func.func @transform_5(%arg0: i32, %arg1: i32) -> (i32, i32) {
    %c0_i32 = arith.constant 0 : i32
    %c0_i32_0 = arith.constant 0 : i32
    %c0_i32_1 = arith.constant 0 : i32
    return %c0_i32, %c0_i32_0 : i32, i32
  }
  func.func @transform_6(%arg0: i32, %arg1: i32) -> (i32, i32) {
    %c0_i32 = arith.constant 0 : i32
    %c0_i32_0 = arith.constant 0 : i32
    %c0_i32_1 = arith.constant 0 : i32
    return %c0_i32, %c0_i32_0 : i32, i32
  }
  func.func @transform_7(%arg0: i32, %arg1: i32) -> (i32, i32) {
    %c0_i32 = arith.constant 0 : i32
    %c0_i32_0 = arith.constant 0 : i32
    %c0_i32_1 = arith.constant 0 : i32
    return %c0_i32, %c0_i32_0 : i32, i32
  }
  func.func @transform_8(%arg0: i32, %arg1: i32) -> (i32, i32) {
    %c0_i32 = arith.constant 0 : i32
    %c0_i32_0 = arith.constant 0 : i32
    return %arg0, %c0_i32 : i32, i32
  }
}

</mosaic_0001>

<bundles_post_ra>
// kernel: tpu_custom_call.1
= control target key start
LH: loop header
LB: loop body
LE: loop exit
PB: predicated region body
PF: predicated region fallthrough
CT: control target
= control target key end

     0   :  { %s1520_s0 = inlined_call_operand.vmem [shape: f32[8,512], index: 0, kind: input, shape index: {}]   ;;  %s1521_s1 = inlined_call_operand.vmem [shape: f32[8,512], index: 1, kind: input, shape index: {}]   ;;  %s1522_s2 = inlined_call_operand.vmem [shape: f32[8,512], index: 2, kind: input, shape index: {}]   ;;  %s1523_s3 = inlined_call_operand.vmem [shape: f32[32,8], index: 3, kind: input, shape index: {}]   ;;  %s1524_s4 = inlined_call_operand.vmem [shape: f32[32,8], index: 4, kind: input, shape index: {}]   ;;  %s1525_s5 = inlined_call_operand.vmem [shape: f32[32,1], index: 5, kind: input, shape index: {}]   ;;  %s1526_s6 = inlined_call_operand.vmem [shape: f32[32,1], index: 6, kind: input, shape index: {}]   ;;  %s1527_s7 = inlined_call_operand.<no memory space> [shape: f32[1,1], index: 7, kind: input, shape index: {}]   ;;  %s1528_s8 = inlined_call_operand.hbm [shape: f32[16,128], index: 8, kind: output, shape index: {}]  }
   0x1   :  { %v13_v0 = vstv %s1527_s7 }
   0x2   :  { %14 = vst [vmem:[#allocation5] sm:$0x1] %v13_v0 }
   0x3   :  { %15 = vsyncpa [#allocation7], 0 }
   0x4   :  { %17 = vsyncpa [#allocation7 + $0x1], 0  ;;  %s1301_s29 = smov 0   ;;  %s1303_s30 = smov 0  }
   0x5   :  { %s1305_s9 = smov 0   ;;  %s1307_s10 = smov 0  }
   0x6   :  { %s1309_s11 = smov 0   ;;  %s1311_s12 = smov 0  }
   0x7   :  { %s1313_s13 = smov 0   ;;  %s1315_s14 = smov 0  }
   0x8 LB: > { %1533 = sst [smem:[#allocation9_spill]] %s1238_s12  ;;  %s984_s7 = sadd.s32 4294967295, %s1246_s14   ;;  %s1246_s14 = sphi %s1315_s14, %s23_s14   ;;  %s1242_s13 = sphi %s1313_s13, %s1545_s13   ;;  %s1238_s12 = sphi %s1311_s12, %s1544_s12   ;;  %s1234_s11 = sphi %s1309_s11, %s1543_s11   ;;  %s1230_s10 = sphi %s1307_s10, %s1542_s10   ;;  %s1226_s9 = sphi %s1305_s9, %s1548_s9   ;;  %s1222_s30 = sphi %s1303_s30, %s1547_s30   ;;  %s1218_s29 = sphi %s1301_s29, %s1546_s29  }
   0x9   : > { %1534 = sst [smem:[#allocation10_spill]] %s1242_s13  ;;  %s985_s15 = sadd.s32 4294967294, %s1246_s14  }
   0xa   : > { %s32_s16 = sadd.s32 1, %s1238_s12  ;;  %s35_s17 = sadd.s32 1, %s1242_s13 }
   0xb   : > { %p33_p0 = scmp.ge.s32.totalorder %s32_s16, 2  ;;  %p247_p1 = scmp.ne.s32.totalorder %s1226_s9, %s1222_s30 }
   0xc   : > { %p248_p2 = scmp.eq.s32.totalorder %s984_s7, 3  ;;  %p253_p4 = scmp.ne.s32.totalorder %s1222_s30, %s1218_s29 }
   0xd   : > { %s1550_s16 = smov (%p33_p0, %s32_s16), 0  ;;  %s1552_s17 = smov (!%p33_p0, %s35_s17), %s1242_s13 }
   0xe   : > { %1535 = sst [smem:[#allocation11_spill]] %s1550_s16  ;;  %p1350_p3 = por %p248_p2, %p247_p1 }
   0xf   : > { %p37_p5 = scmp.ge.s32.totalorder %s1552_s17, 2  ;;  %p254_p6 = scmp.eq.s32.totalorder %s985_s15, 3 }
  0x10   : > { %p994_p7 = scmp.ge.s32.totalorder %s1246_s14, 1  ;;  %p320_p8 = scmp.lt.s32.totalorder %s1246_s14, 5 }
  0x11   : > { %s1554_s17 = smov (%p37_p5, %s1552_s17), 0  ;;  %p1360_p9 = por %p254_p6, %p253_p4 }
  0x12   : > { %1537 = sst [smem:[#allocation12_spill]] %s1554_s17  ;;  %p321_p10 = pnand %p994_p7, %p320_p8 }
  0x13   : > { %s234_s20 = ssub.s32 %s1242_s13, %s1554_s17  ;;  %s237_s21 = sadd.s32 1, %s1226_s9 }
  0x14   : > { %p235_p11 = scmp.eq.s32.totalorder %s234_s20, 0  ;;  %324 = sbr.rel (%p321_p10) target bundleno = 759 (0x2f7), region = 52 }
  0x15   : > { %s1532_s23 = sand.u32 (!%p321_p10), 1, %s1222_s30   ;;  %s996_s24 = sshll.u32 (!%p321_p10), %s1234_s11, 1 }
  0x16   : > { %s1368_s22 = scalar_select %p235_p11, %s1226_s9, %s237_s21  }
  0x17   : > { %s1374_s25 = sshll.u32 (!%p321_p10), %s1532_s23, 3  ;;  %s1377_s26 = sadd.s32 (!%p321_p10), %s1230_s10, %s996_s24 }
  0x18   : > { %1539 = sst [smem:[#allocation13_spill]] %s1368_s22  ;;  %p369_p12 = scmp.lt.s32.totalorder (!%p321_p10), %s1377_s26, 3 }
  0x19   : > { %s366_s22 = scalar_lea.vmem (!%p321_p10), [#allocation6], %s1374_s25  ;;  %p1002_p13 = scmp.ne.s32.totalorder (!%p321_p10), %s1230_s10, 0 }
  0x1b   : > { %s370_s27 = scalar_select %p369_p12, %s1377_s26, 3 }
  0x1c   : > { %394 = sbr.rel (%p1002_p13) target bundleno = 35 (0x23), region = 56  ;;  %v1248_v1 = vmov (!%p1002_p13), 0.0   ;;  %v1249_v2 = vmov (!%p1002_p13), -1e+30  }
  0x1d   : > { %s997_s28 = sshll.u32 %s370_s27, 3  ;;  %395 = vst [vmem:[#allocation2] sm:$0x1] (!%p1002_p13), %v1248_v1  ;;  %397 = vst [vmem:[#allocation4] sm:$0x1] (!%p1002_p13), %v1248_v1 }
  0x1e   : > { %s372_s20 = scalar_lea.vmem %s1520_s0, %s997_s28  ;;  %s380_s16 = scalar_lea.vmem %s1521_s1, %s997_s28  ;;  %396 = vst [vmem:[#allocation3] sm:$0x1] (!%p1002_p13), %v1249_v2 }
  0x1f   : > { %s388_s23 = scalar_lea.vmem %s1522_s2, %s997_s28 }
  0x23 PF: > { %v407_v3 = vld [vmem:[%s380_s16] sm:$0xff]  ;;  %vm408_vm0 = vcmask 64512   ;;  %v404_v5 = vld [vmem:[%s1524_s4 + $0x8] sm:$0xff]  ;;  %v405_v7 = vld [vmem:[%s1524_s4 + $0x10] sm:$0xff]  ;;  %v1250_v15 = vmov 0   ;;  %s1016_s15 = sshll.u32 %s1377_s26, 7 }
  0x24   : > { %v403_v4 = vld [vmem:[%s1524_s4] sm:$0xff]  ;;  %1037 = vmatprep.subr.mxu0 %v407_v3  ;;  %1061 = vmatprep.subr.mxu1 %v407_v3  ;;  %v406_v8 = vld [vmem:[%s1524_s4 + $0x18] sm:$0xff]  ;;  %v399_v11 = vld [vmem:[%s1523_s3 + $0x8] sm:$0xff]  ;;  %p1017_p0 = scmp.ne.s32.totalorder %s1230_s10, 1 }
  0x25   : > { %1039 = vmatprep.mubr.msk.f32.mxu0 %vm408_vm0, %v403_v4  ;;  %v402_v6 = vld [vmem:[%s372_s20] sm:$0xff]  ;;  %1038 = vmatpush3.msra.mxu0 %v407_v3  ;;  %v400_v12 = vld [vmem:[%s1523_s3 + $0x10] sm:$0xff]  ;;  %v401_v14 = vld [vmem:[%s1523_s3 + $0x18] sm:$0xff]  ;;  %vm822_vm2 = vcmask (!%p1017_p0), 1040384  }
  0x26   : > { %1040 = vmatmul.mubr.msk.f32.vlgmr.msra.gmra.mrb[0].mxu0 %vm408_vm0, %v404_v5  ;;  %1053 = vmatprep.subr.mxu0 %v402_v6  ;;  %v506_v9 = vld [vmem:[%s388_s23] sm:$0xff]  ;;  %v594_v16 = vld [vmem:[%s1525_s5 + $0x10] sm:$0xff]  ;;  %v593_v17 = vld [vmem:[%s1525_s5 + $0x8] sm:$0xff] }
  0x27   : > { %v398_v10 = vld [vmem:[%s1523_s3] sm:$0xff]  ;;  %1062 = vmatpush3.msra.mxu1 %v407_v3  ;;  %1042 = vmatprep.mubr.msk.f32.mxu1 %vm408_vm0, %v405_v7  ;;  %v595_v18 = vld [vmem:[%s1525_s5 + $0x18] sm:$0xff]  ;;  %v597_v20 = vld [vmem:[%s1526_s6 + $0x8] sm:$0xff] }
  0x28   : > { %1054 = vmatpush3.msra.mxu0 %v402_v6  ;;  %1043 = vmatmul.mubr.msk.f32.vlgmr.msra.gmra.mrb[0].mxu1 %vm408_vm0, %v406_v8  ;;  %v592_v13 = vld [vmem:[%s1525_s5] sm:$0xff]  ;;  %v598_v21 = vld [vmem:[%s1526_s6 + $0x10] sm:$0xff]  ;;  %v599_v22 = vld [vmem:[%s1526_s6 + $0x18] sm:$0xff] }
  0x29   : > { %1045 = vmatprep.subr.mxu1 %v506_v9  ;;  %1055 = vmatprep.mubr.msk.f32.mxu0 %vm408_vm0, %v398_v10  ;;  %v596_v19 = vld [vmem:[%s1526_s6] sm:$0xff] }
  0x2a   : > { %1046 = vmatpush3.msra.mxu1 %v506_v9  ;;  %1056 = vmatmul.mubr.msk.f32.vlgmr.msra.gmra.mrb[2].mxu0 %vm408_vm0, %v399_v11  ;;  %v600_v23 = vld [vmem:[#allocation5] sm:$0x1] }
  0x2b   : > { %1047 = vmatprep.mubr.msk.f32.mxu1 %vm408_vm0, %v403_v4  ;;  %1058 = vmatprep.mubr.msk.f32.mxu0 %vm408_vm0, %v400_v12  ;;  %v772_v12 = vlaneseq }
  0x2c   : > { %1048 = vmatmul.mubr.msk.f32.vlgmr.msra.gmra.mrb[2].mxu1 %vm408_vm0, %v404_v5  ;;  %1144 = vset.pattern.permute.xlu0 %v1250_v15 }
  0x2d   : > { %1050 = vmatprep.mubr.msk.f32.mxu1 %vm408_vm0, %v405_v7  ;;  %603 = vperm.xlu0 %1144, %v592_v13  }
  0x2e   : > { %1059 = vmatmul.mubr.msk.f32.gmra.mrb[4].mxu0 %vm408_vm0, %v401_v14  ;;  %1145 = vset.pattern.permute.xlu1 %v1250_v15 }
  0x2f   : > { %613 = vperm.xlu1 %1145, %v594_v16  }
  0x30   : > { %1051 = vmatmul.mubr.msk.f32.gmra.mrb[4].mxu1 %vm408_vm0, %v406_v8 }
  0x31   : > { %608 = vperm.xlu0 %1144, %v593_v17   ;;  %v1453_v17 = vshrl.u32 %v772_v12, 7 }
  0x33   : > { %618 = vperm.xlu1 %1145, %v595_v18   ;;  %vm862_vm3 = vcmp.eq.s32.totalorder (!%p1017_p0), %v1453_v17, 0  ;;  %vm866_vm4 = vcmp.eq.s32.totalorder (!%p1017_p0), %v1453_v17, 1  ;;  %vm870_vm5 = vcmp.eq.s32.totalorder (!%p1017_p0), %v1453_v17, 2 }
  0x35   : > { %736 = vperm.xlu0 %1144, %v596_v19  }
  0x37   : > { %741 = vperm.xlu1 %1145, %v597_v20   ;;  %v794_v20 = vand.u32 127, %v772_v12 }
  0x39   : > { %746 = vperm.xlu0 %1144, %v598_v21   ;;  %v796_v21 = vstv %s1016_s15 }
  0x3b   : > { %751 = vperm.xlu1 %1145, %v599_v22  }
  0x3d   : > { %769 = vperm.xlu0 %1144, %v600_v23  }
  0xac   : > { %v604_v24 = vpop.permute.xlu0 %603 }
  0xae   : > { %v614_v25 = vpop.permute.xlu1 %613 }
  0xb0   : > { %v609_v29 = vpop.permute.xlu0 %608 }
  0xb2   : > { %v619_v31 = vpop.permute.xlu1 %618 }
  0xb4   : > { %v737_v43 = vpop.permute.xlu0 %736 }
  0xb6   : > { %v742_v48 = vpop.permute.xlu1 %741 }
  0xb8   : > { %v747_v4 = vpop.permute.xlu0 %746 }
  0xba   : > { %v752_v7 = vpop.permute.xlu1 %751 }
  0xf9   : > { %v1041_v26 = vpop.f32.mrb[0].mxu0 }
  0xfa   : > { %v487_v27 = vpop.f32.mrb[1].mxu0 }
  0xfb   : > { %v1044_v28 = vpop.f32.mrb[0].mxu1 }
  0xfc   : > { %v497_v30 = vpop.f32.mrb[1].mxu1 }
  0xfd   : > { %v1057_v32 = vpop.f32.mrb[2].mxu0 }
  0xfe   : > { %v705_v33 = vadd.f32 %v1057_v32, %v609_v29  ;;  %v699_v34 = vpop.f32.mrb[3].mxu0 }
  0xff   : > { %v700_v35 = vadd.f32 %v699_v34, %v604_v24  ;;  %v1049_v36 = vpop.f32.mrb[2].mxu1  ;;  %v774_v24 = vsub.s32 0, %v1453_v17 }
 0x100   : > { %v719_v37 = vadd.f32 %v1041_v26, %v705_v33  ;;  %v727_v38 = vadd.f32 %v1049_v36, %v705_v33  ;;  %v573_v39 = vpop.f32.mrb[3].mxu1 }
 0x101   : > { %v718_v40 = vadd.f32 %v700_v35, %v487_v27  ;;  %v726_v41 = vadd.f32 %v700_v35, %v573_v39  ;;  %v1060_v42 = vpop.f32.mrb[4].mxu0  ;;  %v797_v27 = vadd.s32 %v796_v21, %v794_v20  ;;  %v799_v35 = vld [vmem:[#allocation2] sm:$0x1] }
 0x102   : > { %v723_v44 = vmax.f32 %v719_v37, 0.0  ;;  %v731_v45 = vmax.f32 %v727_v38, 0.0  ;;  %v715_v46 = vadd.f32 %v1060_v42, %v619_v31  ;;  %v709_v47 = vpop.f32.mrb[5].mxu0  ;;  %v804_v37 = vld [vmem:[#allocation3] sm:$0x1] }
 0x103   : > { %v722_v49 = vmax.f32 %v718_v40, 0.0  ;;  %v730_v50 = vmax.f32 %v726_v41, 0.0  ;;  %v710_v51 = vadd.f32 %v709_v47, %v614_v25  ;;  %v1052_v52 = vpop.f32.mrb[4].mxu1  ;;  %vm798_vm1 = vcmp.lt.s32.totalorder %v797_v27, 300 }
 0x104   : > { %v755_v53 = vmul.f32 %v742_v48, %v723_v44  ;;  %v778_v54 = vmul.f32 %v742_v48, %v731_v45  ;;  %v721_v55 = vadd.f32 %v1044_v28, %v715_v46  ;;  %v729_v56 = vadd.f32 %v1052_v52, %v715_v46  ;;  %v583_v57 = vpop.f32.mrb[5].mxu1  ;;  %v770_v28 = vpop.permute.xlu0 %769  ;;  %v806_v46 = vld [vmem:[#allocation4] sm:$0x1] }
 0x105   : > { %v754_v58 = vmul.f32 %v737_v43, %v722_v49  ;;  %v777_v59 = vmul.f32 %v737_v43, %v730_v50  ;;  %v720_v60 = vadd.f32 %v710_v51, %v497_v30  ;;  %v728_v61 = vadd.f32 %v710_v51, %v583_v57 }
 0x106   : > { %v725_v62 = vmax.f32 %v721_v55, 0.0  ;;  %v733_v63 = vmax.f32 %v729_v56, 0.0  ;;  %v775_v31 = vrot.slane %v770_v28, %v774_v24 }
 0x107   : > { %v758_v0 = vadd.f32 %v755_v53, %v754_v58  ;;  %v781_v1 = vadd.f32 %v778_v54, %v777_v59  ;;  %v724_v2 = vmax.f32 %v720_v60, 0.0  ;;  %v732_v3 = vmax.f32 %v728_v61, 0.0 }
 0x108   : > { %v757_v8 = vmul.f32 %v752_v7, %v725_v62  ;;  %v780_v10 = vmul.f32 %v752_v7, %v733_v63 }
 0x109   : > { %v756_v5 = vmul.f32 %v747_v4, %v724_v2  ;;  %v779_v6 = vmul.f32 %v747_v4, %v732_v3 }
 0x10b   : > { %v759_v9 = vadd.f32 %v758_v0, %v756_v5  ;;  %v782_v11 = vadd.f32 %v781_v1, %v779_v6  ;;  %v1251_v5 = vmov (!%p1017_p0), 0.0  }
 0x10c   : > { %v863_v6 = vsel (!%p1017_p0), %vm862_vm3, 1.0, %v1251_v5  ;;  %v871_v27 = vsel (!%p1017_p0), %vm870_vm5, 1.0, %v1251_v5 }
 0x10d   : > { %v760_v13 = vadd.f32 %v759_v9, %v757_v8  ;;  %v783_v14 = vadd.f32 %v782_v11, %v780_v10  ;;  %v867_v8 = vsel (!%p1017_p0), %vm866_vm4, 1.0, %v1251_v5 }
 0x10f   : > { %v761_v15 = vrot.slane %v760_v13, 4  ;;  %v784_v16 = vrot.slane %v783_v14, 4 }
 0x111   : > { %v762_v18 = vadd.f32 %v761_v15, %v760_v13  ;;  %v785_v19 = vadd.f32 %v784_v16, %v783_v14 }
 0x113   : > { %v763_v22 = vrot.slane %v762_v18, 2  ;;  %v786_v23 = vrot.slane %v785_v19, 2 }
 0x115   : > { %v764_v25 = vadd.f32 %v763_v22, %v762_v18  ;;  %v787_v26 = vadd.f32 %v786_v23, %v785_v19 }
 0x117   : > { %v765_v29 = vrot.slane %v764_v25, 1  ;;  %v788_v30 = vrot.slane %v787_v26, 1 }
 0x119   : > { %v766_v32 = vadd.f32 %v765_v29, %v764_v25  ;;  %v789_v33 = vadd.f32 %v788_v30, %v787_v26 }
 0x11b   : > { %v776_v34 = vadd.f32 %v775_v31, %v766_v32  ;;  %v790_v36 = vadd.f32 %v789_v33, %v775_v31 }
 0x11d   : > { %v800_v38 = vsel %vm798_vm1, %v776_v34, 0.0  ;;  %v803_v39 = vsel %vm798_vm1, %v790_v36, -1e+30 }
 0x11e   : > { %v801_v40 = vadd.f32 %v800_v38, %v799_v35  ;;  %v805_v41 = vmax.f32 %v804_v37, %v803_v39 }
 0x120   : > { %802 = vst [vmem:[#allocation2] sm:$0x1] %v801_v40  ;;  %v807_v42 = vsub.f32 %v804_v37, %v805_v41  ;;  %v811_v43 = vsub.f32 %v803_v39, %v805_v41  ;;  %816 = vst [vmem:[#allocation3] sm:$0x1] %v805_v41 }
 0x122   : > { %v808_v44 = vmul.f32 1.442695, %v807_v42  ;;  %v812_v45 = vmul.f32 1.442695, %v811_v43 }
 0x124   : > { %1146 = vpow2.f32 %v808_v44 }
 0x125   : > { %1148 = vpow2.f32 %v812_v45 }
 0x127   : > { %v821_v51 = vld [vmem:[#allocation2] sm:$0x1] (!%p1017_p0)  ;;  %v833_v52 = vld [vmem:[#allocation3] sm:$0x1] (!%p1017_p0) }
 0x128   : > { %v823_v53 = vsel (!%p1017_p0), %vm822_vm2, %v821_v51, 0.0  ;;  %v834_v54 = vsel (!%p1017_p0), %vm822_vm2, %v833_v52, -inf }
 0x129   : > { %824 = vadd.xlane.f32.xlu0 (!%p1017_p0), %v823_v53 }
 0x12d   : > { %820 = sbr.rel (%p1017_p0) target bundleno = 734 (0x2de), region = 60  ;;  %835 = vmax.xlane.f32.xlu0 (!%p1017_p0), %v834_v54 }
 0x12e   : > { %v1147_v47 = vpop.eup %1146 }
 0x12f   : > { %v810_v48 = vmul.f32 %v1147_v47, %v806_v46  ;;  %v1149_v49 = vpop.eup %1148 }
 0x131   : > { %v814_v50 = vadd.f32 %v1149_v49, %v810_v48 }
 0x133   : > { %815 = vst [vmem:[#allocation4] sm:$0x1] %v814_v50 }
 0x13a   : > { %v848_v15 = vld [vmem:[#allocation4] sm:$0x1] }
 0x1b6   : > { %v825_v55 = vpop.xlane.xlu0 %824 }
 0x1b7   : > { %v826_v56 = vrot.slane %v825_v55, 4 }
 0x1b9   : > { %v827_v57 = vadd.f32 %v826_v56, %v825_v55 }
 0x1ba   : > { %v836_v58 = vpop.xlane.xlu0 %835 }
 0x1bb   : > { %v828_v59 = vrot.slane %v827_v57, 2  ;;  %v837_v60 = vrot.slane %v836_v58, 4 }
 0x1bd   : > { %v838_v61 = vmax.f32 %v836_v58, %v837_v60  ;;  %v829_v62 = vadd.f32 %v828_v59, %v827_v57 }
 0x1bf   : > { %v839_v63 = vrot.slane %v838_v61, 2  ;;  %v830_v0 = vrot.slane %v829_v62, 1 }
 0x1c1   : > { %v840_v1 = vmax.f32 %v838_v61, %v839_v63  ;;  %v831_v2 = vadd.f32 %v830_v0, %v829_v62 }
 0x1c3   : > { %1063 = vpush %v831_v2  ;;  %v841_v3 = vrot.slane %v840_v1, 1 }
 0x1c5   : > { %v842_v4 = vmax.f32 %v840_v1, %v841_v3 }
 0x1c7   : > { %1065 = vpush %v842_v4 }
 0x1f4   : > { %s1064_s10 = spop %1063 }
 0x1f5   : > { %v864_v7 = vstv %s1064_s10 }
 0x1f6   : > { %v865_v10 = vmul.f32 %v864_v7, %v863_v6 }
 0x1f8   : > { %s1066_s26 = spop %1065 }
 0x1f9   : > { %v844_v9 = vstv %s1066_s26 }
 0x1fa   : > { %v845_v11 = vsub.f32 %v833_v52, %v844_v9  ;;  %v868_v12 = vmul.f32 %v867_v8, %v844_v9 }
 0x1fc   : > { %v846_v13 = vmul.f32 1.442695, %v845_v11  ;;  %v869_v14 = vadd.f32 %v868_v12, %v865_v10 }
 0x1fe   : > { %1150 = vpow2.f32 %v846_v13 }
 0x208   : > { %v1151_v16 = vpop.eup %1150 }
 0x209   : > { %v849_v18 = vmul.f32 %v1151_v16, %v848_v15 }
 0x20b   : > { %v850_v19 = vsel %vm822_vm2, %v849_v18, 0.0 }
 0x20c   : > { %851 = vadd.xlane.f32.xlu1 %v850_v19 }
 0x299   : > { %v852_v20 = vpop.xlane.xlu1 %851 }
 0x29a   : > { %v853_v21 = vrot.slane %v852_v20, 4 }
 0x29c   : > { %v854_v22 = vadd.f32 %v853_v21, %v852_v20 }
 0x29e   : > { %v855_v23 = vrot.slane %v854_v22, 2 }
 0x2a0   : > { %v856_v24 = vadd.f32 %v855_v23, %v854_v22 }
 0x2a2   : > { %v857_v25 = vrot.slane %v856_v24, 1 }
 0x2a4   : > { %v858_v26 = vadd.f32 %v857_v25, %v856_v24 }
 0x2a6   : > { %1067 = vpush %v858_v26 }
 0x2d7   : > { %s1068_s21 = spop %1067 }
 0x2d8   : > { %v872_v28 = vstv %s1068_s21 }
 0x2d9   : > { %v873_v29 = vmul.f32 %v872_v28, %v871_v27 }
 0x2db   : > { %v874_v30 = vadd.f32 %v873_v29, %v869_v14 }
 0x2dd   : > { %875 = vst [vmem:[%s366_s22] sm:$0xff] %v874_v30 }
 0x2de PF: > { %s1019_s20 = sshll.u32 %s1234_s11, 7  ;;  %s890_s23 = sshll.u32 %s366_s22, 4  ;;  %s891_s23 = int_to_ptr.vmem [resolvable:$true] %s890_s23 }
 0x2df   : > { %s1469_s17 = scalar_lea.hbm %s1528_s8, %s1019_s20  ;;  %s1540_s7 = sand.u32 1, %s1222_s30  }
 0x2e0   : > { %s877_s12 = scalar_lea.sflag [#allocation7], %s1540_s7  ;;  %s1152_s13 = scalar_lea.vmem %s891_s23, 128 }
 0x2e1   : > { %p1153_p1 = scmp.ne.s32.totalorder %s891_s23, %s1152_s13  ;;  %s1252_s16 = smov [#allocation6]  }
 0x2e2   : > { %s1156_s28 = sshll.u32 %s1252_s16, 4  ;;  %s1157_s28 = int_to_ptr.vmem [resolvable:$false] %s1156_s28 }
 0x2e3   : > { %p1154_p2 = pnand %p1153_p1, %p1350_p3  ;;  %s1158_s15 = scalar_lea.vmem %s1157_s28, 256 }
 0x2e4   : > { %p1159_p5 = scmp.lt.s32.totalorder %s891_s23, %s1157_s28  ;;  %p1160_p6 = scmp.lt.s32.totalorder %s1158_s15, %s1152_s13 }
 0x2e5   : > { %p1155_p4 = pneg %p1154_p2 }
 0x2e6   : > { %p1161_p7 = por %p1160_p6, %p1159_p5 }
 0x2e8   : > { %p1162_p8 = pnand %p1161_p7, %p1155_p4 }
 0x2ea   : > { %1165 = shalt.err (!%p1162_p8)
}
 0x2eb   : > { %s1166_s11 = scalar_lea.hbm %s1469_s17, 128  ;;  %s1170_s10 = scalar_lea.hbm %s1528_s8, 256 }
 0x2ec   : > { %p1167_p10 = scmp.ne.s32.totalorder %s1469_s17, %s1166_s11  ;;  %p1171_p13 = scmp.lt.u32.totalorder %s1469_s17, %s1528_s8 }
 0x2ed   : > { %p1172_p0 = scmp.lt.u32.totalorder %s1170_s10, %s1166_s11  ;;  %p1174_p2 = scmp.lt.u32.totalorder %s1166_s11, %s1469_s17 }
 0x2ee   : > { %p1168_p11 = pnand %p1167_p10, %p1350_p3 }
 0x2ef   : > { %p1173_p1 = por %p1172_p0, %p1171_p13 }
 0x2f0   : > { %p1169_p12 = pneg %p1168_p11 }
 0x2f1   : > { %p1175_p4 = por %p1174_p2, %p1173_p1 }
 0x2f3   : > { %p1176_p5 = pnand %p1175_p4, %p1169_p12 }
 0x2f5   : > { %1179 = shalt.err (!%p1176_p5)
}
 0x2f6   : > { %1069 = dma.vmem_to_hbm [thread:$0]  (%p1350_p3), %s891_s23, 128, %s1469_s17, %s877_s12  }
 0x2f7 PF: > { %p1075_p6 = scmp.ge.s32.totalorder %s1246_s14, 2  ;;  %s902_s20 = sand.u32 1, %s1218_s29  }
 0x2f8   : > { %s903_s24 = scalar_lea.sflag [#allocation7], %s902_s20 }
 0x2f9   : > { %p1072_p7 = pnand %p1075_p6, %p1360_p9 }
 0x2fb   : > { %1213 = dma.done.wait (!%p1072_p7), %s903_s24, 128  }
 0x2fc   : > { %1215 = vsyncadd (!%p1072_p7), %s903_s24, 4294967168  ;;  %s23_s14 = sadd.s32 1, %s1246_s14   ;;  %s1541_s27 = sld [smem:[#allocation13_spill]] }
 0x2fd   : > { %p20_p8 = scmp.ge.s32.totalorder %s23_s14, 6   ;;  %s1542_s10 = sld [smem:[#allocation9_spill]] }
 0x2fe   : > { %s1543_s11 = sld [smem:[#allocation10_spill]]  ;;  %s1544_s12 = sld [smem:[#allocation11_spill]] }
 0x2ff   : > { %s1545_s13 = sld [smem:[#allocation12_spill]]  ;;  %s1546_s29 = smov %s1222_s30 }
 0x300   : > { %s1547_s30 = smov %s1226_s9  ;;  %22 = sbr.rel (!%p20_p8) target bundleno = 8 (0x8), region = 101 }
 0x302   : > { %s1548_s9 = smov %s1541_s27 }
 0x307   :  { %908 = vsyncpa [#allocation7], 1 }
 0x308   :  { %910 = vsyncpa [#allocation7 + $0x1], 1 }

</bundles_post_ra>
